<compile_context>
chip_gen: v7x
topology: tpu7x:2x2x1
jax: 0.10.0
libtpu: 0.0.40
codegen_flags: <defaults>
</compile_context>

<pallas_src>
import jax
import jax.numpy as jnp
from jax.experimental import pallas as pl
from jax.experimental.pallas import tpu as pltpu


def boxhead_kernel(x_ref, w1_ref, b1_ref, w2_ref, b2_ref, o_ref):
    # x_ref:  (TR, pack*IN)        packed batch tile (pack original rows / row)
    # w1_ref: (pack*IN, pack*HID)  block-diagonal Linear-1 weight (resident)
    # b1_ref: (1, pack*HID)
    # w2_ref: (pack*HID, pack*OUT) block-diagonal Linear-2 weight (resident)
    # b2_ref: (1, pack*OUT)
    # o_ref:  (TR, pack*OUT)
    h = jnp.dot(x_ref[...], w1_ref[...], preferred_element_type=jnp.float32)
    h = jnp.maximum(h + b1_ref[...], 0.0)                       # Linear-1 + ReLU
    z = jnp.dot(h, w2_ref[...], preferred_element_type=jnp.float32) + b2_ref[...]
    # Exact sigmoid: exp and divide both go to the EUP slot, which is idle
    # here (kernel is DMA/MXU bound), so exactness is free.
    o_ref[...] = (1.0 / (1.0 + jnp.exp(-z))).astype(o_ref.dtype)


def _round_up(n, m):
    return ((n + m - 1) // m) * m


def _block_diag_replicate(w, k):
    """(in, out) -> (k*in, k*out) block-diagonal with k copies of w."""
    in_f, out_f = w.shape
    eye = jnp.eye(k, dtype=w.dtype)
    t = eye[:, None, :, None] * w[None, :, None, :]       # (k, in, k, out)
    return t.reshape(k * in_f, k * out_f)


def box_head_forward(x, params, *, pack=4, tile_rows=None):
    """x: (B, inplanes) float32. params: dict with w1,b1,w2,b2 (weights (in,out))."""
    B, IN = x.shape
    w1, b1, w2, b2 = params["w1"], params["b1"], params["w2"], params["b2"]
    HID = w1.shape[1]
    OUT = w2.shape[1]

    # Wrapper-side packing: `pack` batch rows per matrix row -> contiguous,
    # lane-denser output rows. (For production, precompute the packed weights
    # once; the construction here is ~16K elements, i.e. negligible.)
    w1p = _block_diag_replicate(w1, pack)       # (pack*IN,  pack*HID)
    b1p = jnp.tile(b1, (1, pack))               # (1, pack*HID)
    w2p = _block_diag_replicate(w2, pack)       # (pack*HID, pack*OUT)
    b2p = jnp.tile(b2, (1, pack))               # (1, pack*OUT)

    n_rows = pl.cdiv(B, pack)                   # packed rows needed
    if tile_rows is None:
        # Target ~2 MiB of x per grid step to amortize per-step overhead,
        # capped at 4096 packed rows; keep grid >= 2 where possible so both
        # v7x TensorCores get work; keep tiles sublane-aligned (multiple of 8).
        bytes_per_row = pack * IN * 4
        target = max(8, ((min(4096, (2 << 20) // bytes_per_row)) // 8) * 8)
        half = max(8, _round_up(pl.cdiv(n_rows, 2), 8))
        tile_rows = min(target, half)
    grid_rows = pl.cdiv(n_rows, tile_rows)
    rows_pad = grid_rows * tile_rows
    B_pad = rows_pad * pack

    x_pad = jnp.pad(x, ((0, B_pad - B), (0, 0))) if B_pad != B else x
    x_packed = x_pad.reshape(rows_pad, pack * IN)

    flops = 2 * rows_pad * (pack * IN * pack * HID + pack * HID * pack * OUT)
    bytes_accessed = 4 * (rows_pad * pack * IN + rows_pad * pack * OUT
                          + pack * IN * pack * HID + pack * HID
                          + pack * HID * pack * OUT + pack * OUT)
    cost = pl.CostEstimate(flops=flops,
                           transcendentals=rows_pad * pack * OUT,
                           bytes_accessed=bytes_accessed)

    out_packed = pl.pallas_call(
        boxhead_kernel,
        out_shape=jax.ShapeDtypeStruct((rows_pad, pack * OUT), x.dtype),
        grid=(grid_rows,),
        in_specs=[
            pl.BlockSpec((tile_rows, pack * IN), lambda i: (i, 0)),   # x tile
            pl.BlockSpec((pack * IN, pack * HID), lambda i: (0, 0)),  # W1 (resident)
            pl.BlockSpec((1, pack * HID), lambda i: (0, 0)),          # b1
            pl.BlockSpec((pack * HID, pack * OUT), lambda i: (0, 0)), # W2
            pl.BlockSpec((1, pack * OUT), lambda i: (0, 0)),          # b2
        ],
        out_specs=pl.BlockSpec((tile_rows, pack * OUT), lambda i: (i, 0)),
        compiler_params=pltpu.CompilerParams(
            dimension_semantics=("parallel",)),
        cost_estimate=cost,
    )(x_packed, w1p, b1p, w2p, b2p)

    # Unpack: (rows_pad, pack*OUT) -> (B_pad, OUT) row-major, drop padding rows.
    return out_packed.reshape(B_pad, OUT)[:B]


def init_box_head_params(key, inplanes, config, outplanes=4):
    """Deterministic synthetic init. Weights stored as (in, out)."""
    dims = [inplanes] + list(config) + [outplanes]
    k1, k2, k3, k4 = jax.random.split(key, 4)
    in0, h, out = dims[0], dims[1], dims[2]
    s1 = 1.0 / jnp.sqrt(in0)
    s2 = 1.0 / jnp.sqrt(h)
    return {
        "w1": jax.random.uniform(k1, (in0, h), jnp.float32, -s1, s1),
        "b1": jax.random.uniform(k2, (1, h), jnp.float32, -s1, s1),
        "w2": jax.random.uniform(k3, (h, out), jnp.float32, -s2, s2),
        "b2": jax.random.uniform(k4, (1, out), jnp.float32, -s2, s2),
    }


def box_head_reference(x, params):
    """Pure-JAX reference of the PyTorch forward (exact sigmoid)."""
    h = jnp.maximum(x @ params["w1"] + params["b1"], 0.0)
    return jax.nn.sigmoid(h @ params["w2"] + params["b2"])


if __name__ == "__main__":
    key = jax.random.PRNGKey(0)
    kx, kp = jax.random.split(key)

    # BoxHead(inplanes=32, config=[32]) -> Linear(32,32)+ReLU+Linear(32,4)+Sigmoid
    B, INPLANES, HIDDEN = 100, 32, 32   # B not a multiple of tile: exercises padding
    x = jax.random.normal(kx, (B, INPLANES), dtype=jnp.float32)
    params = init_box_head_params(kp, INPLANES, [HIDDEN], outplanes=4)

    out = box_head_forward(x, params)            # pack=4, auto tile -> grid of 2
    out = jax.block_until_ready(out)

    ref = box_head_reference(x, params)
    assert out.shape == (B, 4)
    # Tolerance covers possible MXU f32 multi-pass vs XLA dot precision deltas.
    assert jnp.allclose(out, ref, atol=2e-3, rtol=0.0)

    print("KERNEL_OK")
</pallas_src>

<mosaic_0001>
module attributes {stable_mosaic.version = 11 : i64} {
  func.func @boxhead_kernel(%arg0: i32, %arg1: memref<16x128xf32, #tpu.memory_space<vmem>>, %arg2: memref<128x128xf32, #tpu.memory_space<vmem>>, %arg3: memref<1x128xf32, #tpu.memory_space<vmem>>, %arg4: memref<128x16xf32, #tpu.memory_space<vmem>>, %arg5: memref<1x16xf32, #tpu.memory_space<vmem>>, %arg6: memref<16x16xf32, #tpu.memory_space<vmem>>) attributes {dimension_semantics = [#tpu.dimension_semantics<parallel>], iteration_bounds = array<i64: 2>, scalar_prefetch = 0 : i64, scratch_operands = 0 : i64, tpu.core_type = #tpu.core_type<tc>, window_params = [{transform_indices = @transform_0, window_bounds = array<i64: 16, 128>}, {pipeline_mode = #tpu.pipeline_mode<synchronous>, transform_indices = @transform_1, window_bounds = array<i64: 128, 128>}, {pipeline_mode = #tpu.pipeline_mode<synchronous>, transform_indices = @transform_2, window_bounds = array<i64: 1, 128>}, {pipeline_mode = #tpu.pipeline_mode<synchronous>, transform_indices = @transform_3, window_bounds = array<i64: 128, 16>}, {pipeline_mode = #tpu.pipeline_mode<synchronous>, transform_indices = @transform_4, window_bounds = array<i64: 1, 16>}, {transform_indices = @transform_5, window_bounds = array<i64: 16, 16>}]} {
    %c0 = arith.constant 0 : index
    %c0_0 = arith.constant 0 : index
    %0 = vector.load %arg1[%c0, %c0_0] : memref<16x128xf32, #tpu.memory_space<vmem>>, vector<16x128xf32>
    %c0_1 = arith.constant 0 : index
    %c0_2 = arith.constant 0 : index
    %1 = vector.load %arg2[%c0_1, %c0_2] : memref<128x128xf32, #tpu.memory_space<vmem>>, vector<128x128xf32>
    %cst = arith.constant dense<0.000000e+00> : vector<16x128xf32>
    %2 = tpu.matmul %0, %1, %cst {dimension_numbers = #tpu.dot_dimension_numbers<[1], [0], [0], [1], [0, 0, 1, 1], [], []>} : vector<16x128xf32>, vector<128x128xf32>, vector<16x128xf32> -> vector<16x128xf32>
    %c0_3 = arith.constant 0 : index
    %c0_4 = arith.constant 0 : index
    %3 = vector.load %arg3[%c0_3, %c0_4] : memref<1x128xf32, #tpu.memory_space<vmem>>, vector<1x128xf32>
    %4 = vector.broadcast %3 : vector<1x128xf32> to vector<16x128xf32>
    %5 = arith.addf %2, %4 : vector<16x128xf32>
    %cst_5 = arith.constant 0.000000e+00 : f32
    %6 = vector.broadcast %cst_5 : f32 to vector<16x128xf32>
    %7 = arith.maximumf %5, %6 : vector<16x128xf32>
    %c0_6 = arith.constant 0 : index
    %c0_7 = arith.constant 0 : index
    %8 = vector.load %arg4[%c0_6, %c0_7] : memref<128x16xf32, #tpu.memory_space<vmem>>, vector<128x16xf32>
    %cst_8 = arith.constant dense<0.000000e+00> : vector<16x16xf32>
    %9 = tpu.matmul %7, %8, %cst_8 {dimension_numbers = #tpu.dot_dimension_numbers<[1], [0], [0], [1], [0, 0, 1, 1], [], []>} : vector<16x128xf32>, vector<128x16xf32>, vector<16x16xf32> -> vector<16x16xf32>
    %c0_9 = arith.constant 0 : index
    %c0_10 = arith.constant 0 : index
    %10 = vector.load %arg5[%c0_9, %c0_10] : memref<1x16xf32, #tpu.memory_space<vmem>>, vector<1x16xf32>
    %11 = vector.broadcast %10 : vector<1x16xf32> to vector<16x16xf32>
    %12 = arith.addf %9, %11 : vector<16x16xf32>
    %cst_11 = arith.constant 0.000000e+00 : f32
    %13 = vector.broadcast %cst_11 : f32 to vector<16x16xf32>
    %14 = arith.subf %13, %12 : vector<16x16xf32>
    %15 = math.exp %14 : vector<16x16xf32>
    %cst_12 = arith.constant 1.000000e+00 : f32
    %16 = vector.broadcast %cst_12 : f32 to vector<16x16xf32>
    %17 = arith.addf %16, %15 : vector<16x16xf32>
    %cst_13 = arith.constant 1.000000e+00 : f32
    %18 = vector.broadcast %cst_13 : f32 to vector<16x16xf32>
    %19 = arith.divf %18, %17 : vector<16x16xf32>
    %c0_14 = arith.constant 0 : index
    %c0_15 = arith.constant 0 : index
    %20 = vector.load %arg6[%c0_14, %c0_15] : memref<16x16xf32, #tpu.memory_space<vmem>>, vector<16x16xf32>
    tpu.vector_store %arg6[%c0_14, %c0_15], %19 {strides = array<i32>} : memref<16x16xf32, #tpu.memory_space<vmem>>, vector<16x16xf32>,
    return
  }
  func.func @transform_0(%arg0: i32) -> (i32, i32) {
    %c0_i32 = arith.constant 0 : i32
    %c0_i32_0 = arith.constant 0 : i32
    return %arg0, %c0_i32 : i32, i32
  }
  func.func @transform_1(%arg0: i32) -> (i32, i32) {
    %c0_i32 = arith.constant 0 : i32
    %c0_i32_0 = arith.constant 0 : i32
    %c0_i32_1 = arith.constant 0 : i32
    return %c0_i32, %c0_i32_0 : i32, i32
  }
  func.func @transform_2(%arg0: i32) -> (i32, i32) {
    %c0_i32 = arith.constant 0 : i32
    %c0_i32_0 = arith.constant 0 : i32
    %c0_i32_1 = arith.constant 0 : i32
    return %c0_i32, %c0_i32_0 : i32, i32
  }
  func.func @transform_3(%arg0: i32) -> (i32, i32) {
    %c0_i32 = arith.constant 0 : i32
    %c0_i32_0 = arith.constant 0 : i32
    %c0_i32_1 = arith.constant 0 : i32
    return %c0_i32, %c0_i32_0 : i32, i32
  }
  func.func @transform_4(%arg0: i32) -> (i32, i32) {
    %c0_i32 = arith.constant 0 : i32
    %c0_i32_0 = arith.constant 0 : i32
    %c0_i32_1 = arith.constant 0 : i32
    return %c0_i32, %c0_i32_0 : i32, i32
  }
  func.func @transform_5(%arg0: i32) -> (i32, i32) {
    %c0_i32 = arith.constant 0 : i32
    %c0_i32_0 = arith.constant 0 : i32
    return %arg0, %c0_i32 : i32, i32
  }
}

</mosaic_0001>

<bundles_post_ra>
// kernel: tpu_custom_call.1
= control target key start
LH: loop header
LB: loop body
LE: loop exit
PB: predicated region body
PF: predicated region fallthrough
CT: control target
= control target key end

     0   :  { %10 = vsyncpa [#allocation3], 0  ;;  %s1079_s0 = inlined_call_operand.hbm [shape: f32[32,128], index: 0, kind: input, shape index: {}]   ;;  %s1080_s1 = inlined_call_operand.vmem [shape: f32[128,128], index: 1, kind: input, shape index: {}]   ;;  %s1081_s2 = inlined_call_operand.vmem [shape: f32[1,128], index: 2, kind: input, shape index: {}]   ;;  %s1082_s3 = inlined_call_operand.vmem [shape: f32[128,16], index: 3, kind: input, shape index: {}]   ;;  %s1083_s4 = inlined_call_operand.vmem [shape: f32[1,16], index: 4, kind: input, shape index: {}]   ;;  %s1084_s5 = inlined_call_operand.vmem [shape: f32[32,16], index: 5, kind: output, shape index: {}]  }
   0x1   :  { %12 = vsyncpa [#allocation3 + $0x1], 0  ;;  %s863_s18 = smov 0   ;;  %s865_s19 = smov 0  }
   0x2   :  { %s867_s20 = smov 0   ;;  %s869_s21 = smov 0  }
   0x3 LB: > { %s529_s22 = sadd.s32 4294967295, %s828_s21   ;;  %s883_s23 = sadd.s32 1, %s828_s21   ;;  %s828_s21 = sphi %s869_s21, %s1091_s21   ;;  %s824_s20 = sphi %s867_s20, %s1090_s20   ;;  %s820_s19 = sphi %s865_s19, %s1089_s19   ;;  %s816_s18 = sphi %s863_s18, %s1088_s18  }
   0x4   : > { %s22_s24 = ssub.s32 %s828_s21, %s883_s23  ;;  %s25_s25 = sadd.s32 1, %s824_s20 }
   0x5   : > { %p23_p0 = scmp.eq.s32.totalorder %s22_s24, 0  ;;  %p32_p1 = scmp.ne.s32.totalorder %s824_s20, %s820_s19 }
   0x6   : > { %p33_p2 = scmp.eq.s32.totalorder %s828_s21, 0  ;;  %p38_p3 = scmp.ne.s32.totalorder %s820_s19, %s816_s18 }
   0x7   : > { %s893_s26 = scalar_select %p23_p0, %s824_s20, %s25_s25  }
   0x8   : > { %p34_p4 = por %p33_p2, %p32_p1  ;;  %p39_p5 = scmp.eq.s32.totalorder %s529_s22, 0 }
   0x9   : > { %p721_p6 = scmp.lt.s32.totalorder %s828_s21, 2  ;;  %s184_s28 = sand.u32 1, %s824_s20  }
   0xa   : > { %p898_p7 = por %p39_p5, %p38_p3  ;;  %s533_s29 = sshll.u32 %s184_s28, 4 }
   0xb   : > { %s544_s30 = sshll.u32 %s828_s21, 8  ;;  %s188_s9 = scalar_lea.vmem [#allocation2], %s533_s29 }
   0xc   : > { %s907_s8 = scalar_lea.hbm %s1079_s0, %s544_s30  ;;  %s195_s10 = sshll.u32 %s188_s9, 4  ;;  %s909_s10 = int_to_ptr.vmem [resolvable:$true] %s195_s10 }
   0xd   : > { %p911_p8 = pnand %p721_p6, %p34_p4  ;;  %s916_s12 = scalar_lea.sflag [#allocation3], %s184_s28 }
   0xe   : > { %s764_s13 = scalar_lea.hbm %s907_s8, 256  ;;  %s769_s16 = scalar_lea.hbm %s1079_s0, 512 }
   0xf   : > { %p765_p10 = scmp.ne.s32.totalorder %s907_s8, %s764_s13  ;;  %p766_p11 = pneg %p911_p8 }
  0x10   : > { %p770_p0 = scmp.lt.u32.totalorder %s907_s8, %s1079_s0  ;;  %p771_p1 = scmp.lt.u32.totalorder %s769_s16, %s764_s13 }
  0x11   : > { %p767_p12 = pnand %p766_p11, %p765_p10  ;;  %p773_p3 = scmp.lt.u32.totalorder %s764_s13, %s907_s8 }
  0x12   : > { %p772_p2 = por %p771_p1, %p770_p0 }
  0x13   : > { %p768_p13 = pneg %p767_p12 }
  0x14   : > { %p774_p4 = por %p773_p3, %p772_p2 }
  0x16   : > { %p775_p5 = pnand %p774_p4, %p768_p13 }
  0x18   : > { %778 = shalt.err (!%p775_p5)
}
  0x19   : > { %s779_s24 = scalar_lea.vmem %s909_s10, 256  ;;  %s830_s25 = smov [#allocation2]  }
  0x1a   : > { %p780_p6 = scmp.ne.s32.totalorder %s909_s10, %s779_s24  ;;  %s784_s28 = sshll.u32 %s830_s25, 4  ;;  %s785_s28 = int_to_ptr.vmem [resolvable:$false] %s784_s28 }
  0x1b   : > { %s786_s29 = scalar_lea.vmem %s785_s28, 512  ;;  %p787_p9 = scmp.lt.s32.totalorder %s909_s10, %s785_s28 }
  0x1c   : > { %p782_p10 = pnand %p780_p6, %p766_p11  ;;  %p788_p0 = scmp.lt.s32.totalorder %s786_s29, %s779_s24 }
  0x1e   : > { %p783_p12 = pneg %p782_p10  ;;  %p789_p1 = por %p788_p0, %p787_p9 }
  0x20   : > { %p790_p2 = pnand %p789_p1, %p783_p12 }
  0x22   : > { %793 = shalt.err (!%p790_p2)
}
  0x23   : > { %s831_s30 = smov 128   ;;  %s832_s6 = smov 8  }
  0x24   : > { %720 = dma.hbm_to_vmem [thread:$0]  (!%p911_p8), %s907_s8, 256, %s909_s10, %s916_s12, %s831_s30, %s831_s30, %s832_s6  }
  0x25   : > { %p203_p11 = scmp.lt.s32.totalorder %s828_s21, 3  ;;  %p1087_p13 = scmp.ge.s32.totalorder %s828_s21, 1 }
  0x27   : > { %p204_p3 = pnand %p1087_p13, %p203_p11 }
  0x28   : > { %s209_s7 = sand.u32 (!%p204_p3), 1, %s820_s19  }
  0x29   : > { %207 = sbr.rel (%p204_p3) target bundleno = 547 (0x223), region = 40  ;;  %s948_s9 = sshll.u32 (!%p204_p3), %s209_s7, 4 }
  0x2a   : > { %s210_s13 = scalar_lea.sflag (!%p204_p3), [#allocation3], %s209_s7  ;;  %s213_s14 = scalar_lea.vmem (!%p204_p3), [#allocation2], %s948_s9 }
  0x30   : > { %811 = dma.done.wait (%p898_p7), %s210_s13, 256  }
  0x31   : > { %813 = vsyncadd (%p898_p7), %s210_s13, 4294967040  ;;  %v249_v0 = vld [vmem:[%s1080_s1] sm:$0xff]  ;;  %v250_v1 = vld [vmem:[%s1080_s1 + $0x8] sm:$0xff]  ;;  %s538_s7 = sshll.u32 %s529_s22, 1  ;;  %vm459_vm0 = vcmask 130048  }
  0x32   : > { %v251_v2 = vld [vmem:[%s1080_s1 + $0x10] sm:$0xff]  ;;  %v651_v3 = vpack.c.bf16 %v250_v1, %v249_v0  ;;  %v252_v4 = vld [vmem:[%s1080_s1 + $0x18] sm:$0xff]  ;;  %v253_v6 = vld [vmem:[%s1080_s1 + $0x20] sm:$0xff]  ;;  %p242_p7 = scmp.lt.s32.totalorder %s538_s7, 3 }
  0x33   : > { %v655_v5 = vpack.c.bf16 %v252_v4, %v251_v2  ;;  %v254_v7 = vld [vmem:[%s1080_s1 + $0x28] sm:$0xff]  ;;  %v255_v9 = vld [vmem:[%s1080_s1 + $0x30] sm:$0xff]  ;;  %v256_v10 = vld [vmem:[%s1080_s1 + $0x38] sm:$0xff] }
  0x34   : > { %652 = vmatprep.subr.bf16.mxu0 %v651_v3  ;;  %v659_v8 = vpack.c.bf16 %v254_v7, %v253_v6  ;;  %v247_v11 = vld [vmem:[%s213_s14] sm:$0xff]  ;;  %v350_v13 = vld [vmem:[%s1082_s3 + $0x8] sm:$0xff]  ;;  %v352_v16 = vld [vmem:[%s1082_s3 + $0x18] sm:$0xff]  ;;  %v663_v20 = vpack.c.bf16 %v256_v10, %v255_v9  ;;  %s1093_s7 = smov (!%p242_p7, %s538_s7), 3 }
  0x35   : > { %654 = vmatpush3.bf16.msra.mxu0 %v651_v3  ;;  %613 = vmatprep.mubr.f32.mxu0 %v247_v11  ;;  %v349_v12 = vld [vmem:[%s1082_s3] sm:$0xff]  ;;  %v351_v14 = vld [vmem:[%s1082_s3 + $0x10] sm:$0xff]  ;;  %v354_v19 = vld [vmem:[%s1082_s3 + $0x28] sm:$0xff]  ;;  %s539_s13 = sshll.u32 %s1093_s7, 3 }
  0x36   : > { %656 = vmatprep.subr.bf16.mxu0 %v655_v5  ;;  %v683_v15 = vpack.c.bf16 %v350_v13, %v349_v12  ;;  %v687_v17 = vpack.c.bf16 %v352_v16, %v351_v14  ;;  %v353_v18 = vld [vmem:[%s1082_s3 + $0x20] sm:$0xff]  ;;  %v258_v22 = vld [vmem:[%s1080_s1 + $0x48] sm:$0xff]  ;;  %v355_v24 = vld [vmem:[%s1082_s3 + $0x30] sm:$0xff]  ;;  %s245_s8 = scalar_lea.vmem %s1084_s5, %s539_s13 }
  0x37   : > { %v257_v21 = vld [vmem:[%s1080_s1 + $0x40] sm:$0xff]  ;;  %v691_v23 = vpack.c.bf16 %v354_v19, %v353_v18  ;;  %v356_v25 = vld [vmem:[%s1082_s3 + $0x38] sm:$0xff]  ;;  %v259_v27 = vld [vmem:[%s1080_s1 + $0x50] sm:$0xff] }
  0x38   : > { %684 = vmatprep.subr.bf16.mxu1 %v683_v15  ;;  %v667_v26 = vpack.c.bf16 %v258_v22, %v257_v21  ;;  %v260_v28 = vld [vmem:[%s1080_s1 + $0x58] sm:$0xff]  ;;  %v695_v29 = vpack.c.bf16 %v356_v25, %v355_v24  ;;  %v357_v30 = vld [vmem:[%s1082_s3 + $0x40] sm:$0xff]  ;;  %v358_v31 = vld [vmem:[%s1082_s3 + $0x48] sm:$0xff] }
  0x39   : > { %658 = vmatpush3.bf16.msra.mxu0 %v655_v5  ;;  %686 = vmatpush3.bf16.msra.mxu1 %v683_v15  ;;  %v671_v32 = vpack.c.bf16 %v260_v28, %v259_v27  ;;  %v261_v33 = vld [vmem:[%s1080_s1 + $0x60] sm:$0xff]  ;;  %v262_v34 = vld [vmem:[%s1080_s1 + $0x68] sm:$0xff]  ;;  %v699_v35 = vpack.c.bf16 %v358_v31, %v357_v30  ;;  %v359_v36 = vld [vmem:[%s1082_s3 + $0x50] sm:$0xff] }
  0x3a   : > { %660 = vmatprep.subr.bf16.mxu0 %v659_v8  ;;  %688 = vmatprep.subr.bf16.mxu1 %v687_v17  ;;  %v360_v37 = vld [vmem:[%s1082_s3 + $0x58] sm:$0xff]  ;;  %v675_v38 = vpack.c.bf16 %v262_v34, %v261_v33  ;;  %v263_v39 = vld [vmem:[%s1080_s1 + $0x70] sm:$0xff]  ;;  %v361_v42 = vld [vmem:[%s1082_s3 + $0x60] sm:$0xff] }
  0x3b   : > { %v264_v40 = vld [vmem:[%s1080_s1 + $0x78] sm:$0xff]  ;;  %v703_v41 = vpack.c.bf16 %v360_v37, %v359_v36  ;;  %v362_v43 = vld [vmem:[%s1082_s3 + $0x68] sm:$0xff]  ;;  %v363_v47 = vld [vmem:[%s1082_s3 + $0x70] sm:$0xff] }
  0x3c   : > { %v679_v44 = vpack.c.bf16 %v264_v40, %v263_v39  ;;  %v707_v45 = vpack.c.bf16 %v362_v43, %v361_v42  ;;  %v248_v46 = vld [vmem:[%s213_s14 + $0x8] sm:$0xff]  ;;  %v540_v50 = vld [vmem:[%s1081_s2] ss:$0 sm:$0xff] }
  0x3d   : > { %662 = vmatpush3.bf16.msra.mxu0 %v659_v8  ;;  %690 = vmatpush3.bf16.msra.mxu1 %v687_v17  ;;  %v364_v48 = vld [vmem:[%s1082_s3 + $0x78] sm:$0xff]  ;;  %v541_v57 = vld [vmem:[%s1083_s4] ss:$0 sm:$0xff] }
  0x3e   : > { %664 = vmatprep.subr.bf16.mxu0 %v663_v20  ;;  %692 = vmatprep.subr.bf16.mxu1 %v691_v23  ;;  %v711_v49 = vpack.c.bf16 %v364_v48, %v363_v47 }
  0x41   : > { %666 = vmatpush3.bf16.msra.mxu0 %v663_v20  ;;  %694 = vmatpush3.bf16.msra.mxu1 %v691_v23 }
  0x42   : > { %668 = vmatprep.subr.bf16.mxu0 %v667_v26  ;;  %696 = vmatprep.subr.bf16.mxu1 %v695_v29 }
  0x45   : > { %670 = vmatpush3.bf16.msra.mxu0 %v667_v26  ;;  %698 = vmatpush3.bf16.msra.mxu1 %v695_v29 }
  0x46   : > { %672 = vmatprep.subr.bf16.mxu0 %v671_v32  ;;  %700 = vmatprep.subr.bf16.mxu1 %v699_v35 }
  0x49   : > { %674 = vmatpush3.bf16.msra.mxu0 %v671_v32  ;;  %702 = vmatpush3.bf16.msra.mxu1 %v699_v35 }
  0x4a   : > { %676 = vmatprep.subr.bf16.mxu0 %v675_v38  ;;  %704 = vmatprep.subr.bf16.mxu1 %v703_v41 }
  0x4d   : > { %678 = vmatpush3.bf16.msra.mxu0 %v675_v38  ;;  %706 = vmatpush3.bf16.msra.mxu1 %v703_v41 }
  0x4e   : > { %680 = vmatprep.subr.bf16.mxu0 %v679_v44  ;;  %708 = vmatprep.subr.bf16.mxu1 %v707_v45 }
  0x51   : > { %682 = vmatpush3.bf16.msra.mxu0 %v679_v44  ;;  %710 = vmatpush3.bf16.msra.mxu1 %v707_v45 }
  0x52   : > { %712 = vmatprep.subr.bf16.mxu1 %v711_v49 }
  0x54   : > { %614 = vmatmul.mubr.f32.vlgmr.msra.gmra.mrb[0].mxu0 %v248_v46 }
  0x55   : > { %714 = vmatpush3.bf16.msra.mxu1 %v711_v49 }
 0x127   : > { %v615_v51 = vpop.f32.mrb[0].mxu0 }
 0x128   : > { %v344_v52 = vadd.f32 %v615_v51, %v540_v50  ;;  %v338_v53 = vpop.f32.mrb[1].mxu0 }
 0x129   : > { %v339_v54 = vadd.f32 %v540_v50, %v338_v53 }
 0x12a   : > { %v348_v56 = vmax.f32 %v344_v52, 0.0 }
 0x12b   : > { %v347_v55 = vmax.f32 %v339_v54, 0.0 }
 0x12d   : > { %648 = vmatprep.mubr.f32.mxu1 %v347_v55 }
 0x12e   : > { %649 = vmatmul.mubr.f32.vlgmr.msra.gmra.mrb[0].mxu1 %v348_v56 }
 0x201   : > { %v650_v58 = vpop.f32.mrb[0].mxu1 }
 0x202   : > { %v444_v59 = vadd.f32 %v650_v58, %v541_v57  ;;  %v438_v60 = vpop.f32.mrb[1].mxu1 }
 0x203   : > { %v439_v61 = vadd.f32 %v541_v57, %v438_v60 }
 0x204   : > { %v448_v62 = vsub.f32 0.0, %v444_v59 }
 0x205   : > { %v447_v63 = vsub.f32 0.0, %v439_v61 }
 0x206   : > { %v451_v0 = vmul.f32 1.442695, %v448_v62 }
 0x207   : > { %v449_v1 = vmul.f32 1.442695, %v447_v63 }
 0x208   : > { %756 = vpow2.f32 %v451_v0 }
 0x209   : > { %758 = vpow2.f32 %v449_v1 }
 0x212   : > { %v757_v2 = vpop.eup %756 }
 0x213   : > { %v759_v3 = vpop.eup %758  ;;  %v454_v4 = vadd.f32 1.0, %v757_v2 }
 0x214   : > { %v453_v5 = vadd.f32 1.0, %v759_v3 }
 0x216   : > { %760 = vrcp.f32 %v453_v5 }
 0x217   : > { %762 = vrcp.f32 %v454_v4 }
 0x220   : > { %v761_v6 = vpop.eup %760 }
 0x221   : > { %v763_v7 = vpop.eup %762  ;;  %460 = vst.msk [vmem:[%s245_s8] sm:$0xff] %vm459_vm0, %v761_v6 }
 0x222   : > { %461 = vst.msk [vmem:[%s245_s8 + $0x8] sm:$0xff] %vm459_vm0, %v763_v7 }
 0x223 PF: > { %p15_p8 = scmp.ge.s32.totalorder %s883_s23, 4   ;;  %s1088_s18 = smov %s820_s19 }
 0x224   : > { %s1089_s19 = smov %s824_s20  ;;  %s1090_s20 = smov %s893_s26 }
 0x225   : > { %s1091_s21 = smov %s883_s23  ;;  %17 = sbr.rel (!%p15_p8) target bundleno = 3 (0x3), region = 80 }
 0x22c   :  { %484 = vsyncpa [#allocation3], 1 }
 0x22d   :  { %486 = vsyncpa [#allocation3 + $0x1], 1 }

</bundles_post_ra>
